<compile_context>
chip_gen: v5e
topology: v5e:2x2
jax: 0.10.0
libtpu: 0.0.40
codegen_flags: <defaults>
</compile_context>

<pallas_src>
import math

import jax
import jax.numpy as jnp
from jax.experimental import pallas as pl
from jax.experimental.pallas import tpu as pltpu


def _make_float_kernel(x_ref, o_ref):
    # Hot path: elementwise dtype cast to float32 on the VPU.
    o_ref[...] = x_ref[...].astype(jnp.float32)


# Tiling constants.
#  - cols <= 2048 and rows-per-block = 512 keeps the worst case (int32 in,
#    f32 out) at 4 MiB + 4 MiB per block, x2 double buffers = 16 MiB, which
#    fits every generation's scoped VMEM (v7x: 64 MiB physical / 32 MiB
#    scoped default; v5e gets an explicit vmem_limit_bytes bump below).
#  - 512 rows is a multiple of 32 -> dense sublane packing for f32 (8),
#    bf16 (16) and int8/fp8 (32) inputs alike.
_COL_CANDIDATES = (2048, 1024, 512, 256, 128)
_ROW_TILE = 512


def make_float(x):
    """Pallas equivalent of MakeFloat.forward: cast any input dtype to float32."""
    orig_shape = x.shape
    total = math.prod(orig_shape) if orig_shape else 1

    if total == 0:
        return jnp.zeros(orig_shape, jnp.float32)

    # Pick a lane-dense column width (multiple of 128).  If nothing divides
    # the element count we fall back to 128 columns and pad.
    cols = None
    for c in _COL_CANDIDATES:
        if total % c == 0:
            cols = c
            break
    if cols is None:
        cols = 128

    rows_needed = -(-total // cols)  # ceil div

    if rows_needed <= _ROW_TILE:
        # Single block covering the whole (small) slab.  Block == full array
        # dims, so the (8, 128) divisibility constraint does not apply.
        rows = rows_needed
        row_tile = rows
        grid = (1,)
    else:
        # Tiled, streamed path: pad rows up to a multiple of the row tile so
        # every block is full-size (no ragged masked stores).
        rows = -(-rows_needed // _ROW_TILE) * _ROW_TILE
        row_tile = _ROW_TILE
        grid = (rows // _ROW_TILE,)

    padded_total = rows * cols

    x_flat = x.reshape(-1)
    if padded_total != total:
        x_flat = jnp.pad(x_flat, (0, padded_total - total))
    x2d = x_flat.reshape(rows, cols)

    in_bytes = jnp.dtype(x.dtype).itemsize

    out2d = pl.pallas_call(
        _make_float_kernel,
        out_shape=jax.ShapeDtypeStruct((rows, cols), jnp.float32),
        grid_spec=pltpu.PrefetchScalarGridSpec(
            num_scalar_prefetch=0,
            grid=grid,
            in_specs=[pl.BlockSpec((row_tile, cols), lambda i: (i, 0))],
            out_specs=pl.BlockSpec((row_tile, cols), lambda i: (i, 0)),
        ),
        compiler_params=pltpu.CompilerParams(
            # Row-tile axis is embarrassingly parallel: lets the runtime
            # shard grid steps across both TensorCores on v7x; neutral on
            # single-TC v5e/v6e.
            dimension_semantics=("parallel",),
            # Cover in+out double buffers above v5e's 16 MiB scoped default.
            vmem_limit_bytes=32 * 1024 * 1024,
        ),
        # Purely bandwidth bound: tell XLA's scheduler what this call moves.
        cost_estimate=pl.CostEstimate(
            flops=0,
            transcendentals=0,
            bytes_accessed=total * (in_bytes + 4),
        ),
    )(x2d)

    out_flat = out2d.reshape(-1)
    if padded_total != total:
        out_flat = out_flat[:total]
    return out_flat.reshape(orig_shape)
    # TODO(synk): standalone this can only match XLA's native convert; the
    # real win is fusing the cast into a consumer kernel's load path.


if __name__ == "__main__":
    key = jax.random.PRNGKey(0)

    # 1) Small NCHW int32 input (module-spec shape): single-block path.
    x_int = jax.random.randint(
        key, (2, 4, 16, 16), minval=-128, maxval=128, dtype=jnp.int32
    )
    y = make_float(x_int)
    jax.block_until_ready(y)
    assert y.dtype == jnp.float32
    assert y.shape == x_int.shape
    assert bool(jnp.all(y == x_int.astype(jnp.float32)))

    # 2) bf16 -> f32 small path.
    x_bf16 = jax.random.normal(key, (2, 4, 16, 16), dtype=jnp.bfloat16)
    y2 = make_float(x_bf16)
    jax.block_until_ready(y2)
    assert y2.dtype == jnp.float32
    assert bool(jnp.all(y2 == x_bf16.astype(jnp.float32)))

    # 3) Non-multiple-of-128 element count: exercises the pad/slice fallback.
    x_odd = jax.random.randint(
        jax.random.PRNGKey(1), (3, 5, 7), minval=-10, maxval=10, dtype=jnp.int32
    )
    y3 = make_float(x_odd)
    jax.block_until_ready(y3)
    assert y3.shape == x_odd.shape
    assert bool(jnp.all(y3 == x_odd.astype(jnp.float32)))

    # 4) Larger bf16 input: exercises the tiled, multi-block streaming path
    #    (rows = 1024 > 512 -> grid of 2 row tiles).
    x_big = jax.random.normal(
        jax.random.PRNGKey(2), (2, 4, 512, 512), dtype=jnp.bfloat16
    )
    y4 = make_float(x_big)
    jax.block_until_ready(y4)
    assert y4.dtype == jnp.float32
    assert bool(jnp.all(y4 == x_big.astype(jnp.float32)))

    print("KERNEL_OK")
</pallas_src>

<mosaic_0001>
module attributes {stable_mosaic.version = 11 : i64} {
  func.func @_make_float_kernel(%arg0: i32, %arg1: memref<1x2048xi32, #tpu.memory_space<vmem>>, %arg2: memref<1x2048xf32, #tpu.memory_space<vmem>>) attributes {dimension_semantics = [#tpu.dimension_semantics<parallel>], iteration_bounds = array<i64: 1>, scalar_prefetch = 0 : i64, scratch_operands = 0 : i64, tpu.core_type = #tpu.core_type<tc>, window_params = [{transform_indices = @transform_0, window_bounds = array<i64: 1, 2048>}, {transform_indices = @transform_1, window_bounds = array<i64: 1, 2048>}]} {
    %c0 = arith.constant 0 : index
    %c0_0 = arith.constant 0 : index
    %0 = vector.load %arg1[%c0, %c0_0] : memref<1x2048xi32, #tpu.memory_space<vmem>>, vector<1x2048xi32>
    %1 = arith.sitofp %0 : vector<1x2048xi32> to vector<1x2048xf32>
    %c0_1 = arith.constant 0 : index
    %c0_2 = arith.constant 0 : index
    %2 = vector.load %arg2[%c0_1, %c0_2] : memref<1x2048xf32, #tpu.memory_space<vmem>>, vector<1x2048xf32>
    tpu.vector_store %arg2[%c0_1, %c0_2], %1 {strides = array<i32>} : memref<1x2048xf32, #tpu.memory_space<vmem>>, vector<1x2048xf32>,
    return
  }
  func.func @transform_0(%arg0: i32) -> (i32, i32) {
    %c0_i32 = arith.constant 0 : i32
    %c0_i32_0 = arith.constant 0 : i32
    return %arg0, %c0_i32 : i32, i32
  }
  func.func @transform_1(%arg0: i32) -> (i32, i32) {
    %c0_i32 = arith.constant 0 : i32
    %c0_i32_0 = arith.constant 0 : i32
    return %arg0, %c0_i32 : i32, i32
  }
}

</mosaic_0001>

<bundles_post_ra>
// kernel: tpu_custom_call.1
= control target key start
LH: loop header
LB: loop body
LE: loop exit
PB: predicated region body
PF: predicated region fallthrough
CT: control target
= control target key end

     0   :  { %6 = vsyncpa [#allocation3], 0  ;;  %s118_s0 = inlined_call_operand.hbm [shape: s32[1,2048], index: 0, kind: input, shape index: {}]   ;;  %s119_s1 = inlined_call_operand.hbm [shape: f32[1,2048], index: 1, kind: output, shape index: {}]  }
   0x1   :  { %7 = vsyncpa [#allocation4], 0  ;;  %s13_s8 = sshll.u32 %s118_s0, 4  ;;  %s100_s9 = smov [#allocation2]   ;;  %s14_s8 = int_to_ptr.hbm [resolvable:$true] %s13_s8 }
   0x2   :  { %s15_s10 = sshll.u32 %s100_s9, 4  ;;  %s16_s10 = int_to_ptr.vmem [resolvable:$true] %s15_s10 }
   0x3   :  { %18 = dma.hbm_to_vmem [thread:$0]  %s14_s8, 256, %s16_s10, [#allocation3]  }
   0x4   :  { %96 = dma.done.wait [#allocation3], 256  }
   0x5   :  { %97 = vsyncadd [#allocation3], 4294967040  ;;  %s101_s11 = smov [#allocation5]   ;;  %s36_s15 = sshll.u32 %s119_s1, 4  ;;  %v23_v0 = vld [vmem:[#allocation2] sm:$0xff]  ;;  %v24_v1 = vld [vmem:[#allocation2 + $0x8] sm:$0xff]  ;;  %s37_s15 = int_to_ptr.hbm [resolvable:$true] %s36_s15 }
   0x6   :  { %s34_s12 = sshll.u32 %s101_s11, 4  ;;  %v25_v2 = vcvt.s32.f32 %v23_v0  ;;  %v26_v3 = vcvt.s32.f32 %v24_v1  ;;  %s35_s12 = int_to_ptr.vmem [resolvable:$true] %s34_s12 }
   0x8   :  { %27 = vst [vmem:[#allocation5] sm:$0xff] %v25_v2 }
   0x9   :  { %28 = vst [vmem:[#allocation5 + $0x8] sm:$0xff] %v26_v3 }
   0xa   :  { %39 = dma.vmem_to_hbm [thread:$0]  %s35_s12, 256, %s37_s15, [#allocation4]  }
   0xb   :  { %98 = dma.done.wait [#allocation4], 256  }
   0xc   :  { %99 = vsyncadd [#allocation4], 4294967040 }
   0xd   :  { %44 = vsyncpa [#allocation3], 1 }
   0xe   :  { %45 = vsyncpa [#allocation4], 1 }

</bundles_post_ra>
